<compile_context>
chip_gen: v5e
topology: v5e:2x2
jax: 0.10.0
libtpu: 0.0.40
codegen_flags: <defaults>
</compile_context>

<pallas_src>
import math

import jax
import jax.numpy as jnp
from jax import lax
from jax.experimental import pallas as pl
from jax.experimental.pallas import tpu as pltpu


def _round_up(x, m):
    return (x + m - 1) // m * m


def _round_down(x, m):
    return x // m * m


def _vmem_capacity_bytes():
    # Trace-time hardware query; fall back to the most conservative physical
    # size across supported generations (v7x: 64 MiB per TensorCore).
    try:
        return int(pltpu.get_tpu_info().vmem_capacity_bytes)
    except Exception:
        return 64 << 20


def _make_imae_kernel(*, total_rows, rows_per_block, steps_per_shard,
                      chunk_rows, n_chunks, mask_rows):
    """Builds the kernel with all tiling constants baked in at trace time."""

    def kernel(pred_ref, tgt_ref, sum_ref, cnt_ref):
        # pred_ref / tgt_ref : (B, rows_per_block, L) input tile (native dtype)
        # sum_ref / cnt_ref  : (1, B, L) per-shard per-lane f32 accumulators,
        #                      resident across the "arbitrary" step axis.
        s = pl.program_id(0)
        k = pl.program_id(1)

        @pl.when(k == 0)
        def _():
            sum_ref[...] = jnp.zeros_like(sum_ref)
            cnt_ref[...] = jnp.zeros_like(cnt_ref)

        B, _, L = pred_ref.shape
        base_row = (s * steps_per_shard + k) * rows_per_block

        def chunk_body(c, carry):
            acc_s, acc_c = carry
            r0 = c * chunk_rows
            if chunk_rows % 8 == 0:
                r0 = pl.multiple_of(r0, chunk_rows)
            o = pred_ref[:, pl.ds(r0, chunk_rows), :].astype(jnp.float32)
            t = tgt_ref[:, pl.ds(r0, chunk_rows), :].astype(jnp.float32)

            # valid(target) == (raw target > 0): the full sentinel dance on
            # the target (/1000, ==0 -> -1, 1/x, ==-1 -> 0) yields a positive
            # value exactly when the raw target is positive.
            valid = t > 0.0
            if mask_rows:
                rows = (base_row + r0
                        + lax.broadcasted_iota(jnp.int32, (chunk_rows, 1), 0))
                valid = jnp.logical_and(valid, (rows < total_rows)[None])

            # Outputs sentinel: x in {0, -1000} -> 0, else 1000/x.  The inf
            # from 1000/0 only lands in the discarded select branch.
            o_ok = jnp.logical_and(o != 0.0, o != -1000.0)
            o_r = jnp.where(o_ok, 1000.0 / o, 0.0)
            # 1000/t is only consumed where valid (t > 0); no select needed.
            t_r = 1000.0 / t

            err = jnp.where(valid, jnp.abs(t_r - o_r), 0.0)
            val = valid.astype(jnp.float32)

            # Reduce only the sublane (row) axis; lane partials stay resident.
            return acc_s + jnp.sum(err, axis=1), acc_c + jnp.sum(val, axis=1)

        init = (jnp.zeros((B, L), jnp.float32),
                jnp.zeros((B, L), jnp.float32))
        if n_chunks == 1:
            acc_s, acc_c = chunk_body(0, init)
        else:
            acc_s, acc_c = lax.fori_loop(0, n_chunks, chunk_body, init,
                                         unroll=n_chunks <= 8)

        sum_ref[...] += acc_s[None]
        cnt_ref[...] += acc_c[None]

    return kernel


def imae(outputs, target, *, num_shards=1, max_rows_per_block=2048):
    """outputs, target: [B, ...] depth maps in millimetres (any float dtype).

    num_shards: leading "parallel" grid axis; keep 1 on single-TensorCore
    parts (v5e/v6e), set 2 on dual-TC v7x.
    """
    assert outputs.shape == target.shape
    assert jnp.dtype(outputs.dtype) == jnp.dtype(target.dtype)
    B = int(outputs.shape[0])
    npix = math.prod(int(d) for d in outputs.shape[1:])
    itemsize = jnp.dtype(outputs.dtype).itemsize

    # ---- lane width: a multiple of 128 that divides npix, so the reshape to
    # [B, S, L] is free (no jnp.pad -> no extra full-tensor HBM pass). ----
    L = next((c for c in (512, 256, 128) if npix % c == 0), None)
    if L is None:
        # TODO(synk): rare ragged case (npix not a multiple of 128) still pays
        # one flat-pad copy; could be avoided with a manual-DMA tail block.
        L = 128
    npix_pad = _round_up(npix, L)
    S = npix_pad // L

    # ---- tile rows: per-input DMA-block budget derived from this chip's VMEM
    # (2 inputs x 2 pipeline buffers must sit comfortably below the scoped
    # limit); f32 intermediates are bounded separately by in-kernel chunking.
    vmem_cap = _vmem_capacity_bytes()
    vmem_limit = min(int(vmem_cap * 0.45), 100 << 20)
    block_budget = max(vmem_limit // 8, B * 8 * L * itemsize)
    if S <= 8:
        S_tile = S
    else:
        rows_budget = max(8, _round_down(block_budget // (B * L * itemsize), 8))
        # TODO(synk): for very large B, block the batch axis instead of
        # letting S_tile shrink toward 8 (keeps DMA rows long).
        S_tile = min(rows_budget, _round_up(S, 8), max_rows_per_block)

    # In-kernel row chunk: keeps the f32 temporaries ~<= 1 MiB regardless of
    # how large the DMA block is.
    if S_tile <= 8 or S_tile % 8 != 0:
        chunk_rows = S_tile
    else:
        chunk_rows = 8
        for c in (64, 32, 16, 8):
            if S_tile % c == 0 and B * c * L * 4 <= (1 << 20):
                chunk_rows = c
                break
    n_chunks = S_tile // chunk_rows
    assert n_chunks * chunk_rows == S_tile

    nblocks = pl.cdiv(S, S_tile)            # total row-blocks
    steps = pl.cdiv(nblocks, num_shards)    # row-blocks per shard
    nblocks_total = num_shards * steps
    mask_rows = (nblocks_total * S_tile != S)

    def prep(x):
        x2 = x.reshape(B, npix)
        if npix_pad != npix:
            x2 = jnp.pad(x2, ((0, 0), (0, npix_pad - npix)))
        return x2.reshape(B, S, L)

    pred3 = prep(outputs)
    tgt3 = prep(target)

    if nblocks_total == nblocks:
        in_map = lambda s, k: (0, s * steps + k, 0)
    else:
        last = nblocks - 1                  # clamp fully-OOB shard tail blocks
        in_map = lambda s, k: (0, jnp.minimum(s * steps + k, last), 0)
    out_map = lambda s, k: (s, 0, 0)

    kernel = _make_imae_kernel(
        total_rows=S, rows_per_block=S_tile, steps_per_shard=steps,
        chunk_rows=chunk_rows, n_chunks=n_chunks, mask_rows=mask_rows)

    part_sum, part_cnt = pl.pallas_call(
        kernel,
        out_shape=(
            jax.ShapeDtypeStruct((num_shards, B, L), jnp.float32),
            jax.ShapeDtypeStruct((num_shards, B, L), jnp.float32),
        ),
        grid_spec=pltpu.PrefetchScalarGridSpec(
            num_scalar_prefetch=0,
            grid=(num_shards, steps),
            in_specs=[
                pl.BlockSpec((B, S_tile, L), in_map),
                pl.BlockSpec((B, S_tile, L), in_map),
            ],
            out_specs=(
                pl.BlockSpec((1, B, L), out_map),
                pl.BlockSpec((1, B, L), out_map),
            ),
        ),
        compiler_params=pltpu.CompilerParams(
            dimension_semantics=("parallel", "arbitrary"),
            vmem_limit_bytes=vmem_limit,
        ),
    )(pred3, tgt3)

    loss = jnp.sum(part_sum, axis=(0, 2))   # [B] per-sample |err| sum
    cnt = jnp.sum(part_cnt, axis=(0, 2))    # [B] per-sample valid count
    # NOTE: a sample with zero valid target pixels yields cnt == 0 -> NaN,
    # matching the PyTorch reference.
    return jnp.mean(loss / cnt)


def _imae_ref(outputs, target):
    """Pure-JAX reference mirroring the PyTorch code exactly."""
    o = outputs.astype(jnp.float32) / 1000.0
    t = target.astype(jnp.float32) / 1000.0
    o = jnp.where(o == 0.0, -1.0, o)
    t = jnp.where(t == 0.0, -1.0, t)
    o = 1.0 / o
    t = 1.0 / t
    o = jnp.where(o == -1.0, 0.0, o)
    t = jnp.where(t == -1.0, 0.0, t)
    val = (t > 0.0).astype(jnp.float32)
    err = jnp.abs(t * val - o * val)
    B = err.shape[0]
    loss = jnp.sum(err.reshape(B, -1), axis=-1)
    cnt = jnp.sum(val.reshape(B, -1), axis=-1)
    return jnp.mean(loss / cnt)


if __name__ == "__main__":
    key = jax.random.PRNGKey(0)
    k1, k2, k3, k4 = jax.random.split(key, 4)

    B, C, H, W = 2, 1, 16, 16  # depth maps: NCHW with a single channel

    # Depth-like values in millimetres, with ~30% invalid (zero) pixels.
    outputs = jax.random.uniform(k1, (B, C, H, W), jnp.float32, 500.0, 8000.0)
    target = jax.random.uniform(k2, (B, C, H, W), jnp.float32, 500.0, 8000.0)
    outputs = jnp.where(jax.random.uniform(k3, (B, C, H, W)) < 0.3, 0.0, outputs)
    target = jnp.where(jax.random.uniform(k4, (B, C, H, W)) < 0.3, 0.0, target)

    result = jax.block_until_ready(imae(outputs, target))

    ref = _imae_ref(outputs, target)
    assert jnp.allclose(result, ref, rtol=1e-4, atol=1e-6), (result, ref)

    print("KERNEL_OK")
</pallas_src>

<mosaic_0001>
module attributes {stable_mosaic.version = 11 : i64} {
  func.func @kernel(%arg0: i32, %arg1: i32, %arg2: memref<2x1x256xf32, #tpu.memory_space<vmem>>, %arg3: memref<2x1x256xf32, #tpu.memory_space<vmem>>, %arg4: memref<1x2x256xf32, #tpu.memory_space<vmem>>, %arg5: memref<1x2x256xf32, #tpu.memory_space<vmem>>) attributes {dimension_semantics = [#tpu.dimension_semantics<parallel>, #tpu.dimension_semantics<arbitrary>], iteration_bounds = array<i64: 1, 1>, scalar_prefetch = 0 : i64, scratch_operands = 0 : i64, tpu.core_type = #tpu.core_type<tc>, window_params = [{transform_indices = @transform_0, window_bounds = array<i64: 2, 1, 256>}, {transform_indices = @transform_1, window_bounds = array<i64: 2, 1, 256>}, {transform_indices = @transform_2, window_bounds = array<i64: 1, 2, 256>}, {transform_indices = @transform_3, window_bounds = array<i64: 1, 2, 256>}]} {
    %c0_i32 = arith.constant 0 : i32
    %0 = arith.cmpi eq, %arg1, %c0_i32 : i32
    %1 = arith.extui %0 : i1 to i32
    %c0_i32_0 = arith.constant 0 : i32
    %2 = arith.cmpi ne, %1, %c0_i32_0 : i32
    scf.if %2 {
      %cst_28 = arith.constant 0.000000e+00 : f32
      %38 = vector.broadcast %cst_28 : f32 to vector<1x2x256xf32>
      %c0_29 = arith.constant 0 : index
      %c0_30 = arith.constant 0 : index
      %c0_31 = arith.constant 0 : index
      %39 = vector.load %arg4[%c0_29, %c0_30, %c0_31] : memref<1x2x256xf32, #tpu.memory_space<vmem>>, vector<1x2x256xf32>
      tpu.vector_store %arg4[%c0_29, %c0_30, %c0_31], %38 {strides = array<i32>} : memref<1x2x256xf32, #tpu.memory_space<vmem>>, vector<1x2x256xf32>,
      %cst_32 = arith.constant 0.000000e+00 : f32
      %40 = vector.broadcast %cst_32 : f32 to vector<1x2x256xf32>
      %c0_33 = arith.constant 0 : index
      %c0_34 = arith.constant 0 : index
      %c0_35 = arith.constant 0 : index
      %41 = vector.load %arg5[%c0_33, %c0_34, %c0_35] : memref<1x2x256xf32, #tpu.memory_space<vmem>>, vector<1x2x256xf32>
      tpu.vector_store %arg5[%c0_33, %c0_34, %c0_35], %40 {strides = array<i32>} : memref<1x2x256xf32, #tpu.memory_space<vmem>>, vector<1x2x256xf32>,
    } else {
    }
    %cst = arith.constant 0.000000e+00 : f32
    %3 = vector.broadcast %cst : f32 to vector<2x256xf32>
    %cst_1 = arith.constant 0.000000e+00 : f32
    %4 = vector.broadcast %cst_1 : f32 to vector<2x256xf32>
    %c0 = arith.constant 0 : index
    %c0_2 = arith.constant 0 : index
    %c0_3 = arith.constant 0 : index
    %5 = vector.load %arg2[%c0, %c0_2, %c0_3] : memref<2x1x256xf32, #tpu.memory_space<vmem>>, vector<2x1x256xf32>
    %c0_4 = arith.constant 0 : index
    %c0_5 = arith.constant 0 : index
    %c0_6 = arith.constant 0 : index
    %6 = vector.load %arg3[%c0_4, %c0_5, %c0_6] : memref<2x1x256xf32, #tpu.memory_space<vmem>>, vector<2x1x256xf32>
    %cst_7 = arith.constant 0.000000e+00 : f32
    %7 = vector.broadcast %cst_7 : f32 to vector<2x1x256xf32>
    %8 = arith.cmpf ogt, %6, %7 : vector<2x1x256xf32>
    %cst_8 = arith.constant 0.000000e+00 : f32
    %9 = vector.broadcast %cst_8 : f32 to vector<2x1x256xf32>
    %10 = arith.cmpf one, %5, %9 : vector<2x1x256xf32>
    %cst_9 = arith.constant -1.000000e+03 : f32
    %11 = vector.broadcast %cst_9 : f32 to vector<2x1x256xf32>
    %12 = arith.cmpf one, %5, %11 : vector<2x1x256xf32>
    %13 = arith.andi %10, %12 : vector<2x1x256xi1>
    %cst_10 = arith.constant 1.000000e+03 : f32
    %14 = vector.broadcast %cst_10 : f32 to vector<2x1x256xf32>
    %15 = arith.divf %14, %5 : vector<2x1x256xf32>
    %cst_11 = arith.constant 0.000000e+00 : f32
    %16 = vector.broadcast %cst_11 : f32 to vector<2x1x256xf32>
    %17 = arith.select %13, %15, %16 : vector<2x1x256xi1>, vector<2x1x256xf32>
    %cst_12 = arith.constant 1.000000e+03 : f32
    %18 = vector.broadcast %cst_12 : f32 to vector<2x1x256xf32>
    %19 = arith.divf %18, %6 : vector<2x1x256xf32>
    %20 = arith.subf %19, %17 : vector<2x1x256xf32>
    %21 = math.absf %20 : vector<2x1x256xf32>
    %cst_13 = arith.constant 0.000000e+00 : f32
    %22 = vector.broadcast %cst_13 : f32 to vector<2x1x256xf32>
    %23 = arith.select %8, %21, %22 : vector<2x1x256xi1>, vector<2x1x256xf32>
    %24 = arith.extui %8 : vector<2x1x256xi1> to vector<2x1x256xi32>
    %25 = arith.sitofp %24 : vector<2x1x256xi32> to vector<2x1x256xf32>
    %cst_14 = arith.constant dense<0.000000e+00> : vector<2x256xf32>
    %26 = vector.multi_reduction <add>, %23, %cst_14 [1] : vector<2x1x256xf32> to vector<2x256xf32>
    %27 = arith.addf %3, %26 : vector<2x256xf32>
    %cst_15 = arith.constant dense<0.000000e+00> : vector<2x256xf32>
    %28 = vector.multi_reduction <add>, %25, %cst_15 [1] : vector<2x1x256xf32> to vector<2x256xf32>
    %29 = arith.addf %4, %28 : vector<2x256xf32>
    %c0_16 = arith.constant 0 : index
    %c0_17 = arith.constant 0 : index
    %c0_18 = arith.constant 0 : index
    %30 = vector.load %arg4[%c0_16, %c0_17, %c0_18] : memref<1x2x256xf32, #tpu.memory_space<vmem>>, vector<1x2x256xf32>
    %31 = vector.shape_cast %27 : vector<2x256xf32> to vector<1x2x256xf32>
    %32 = arith.addf %30, %31 : vector<1x2x256xf32>
    %c0_19 = arith.constant 0 : index
    %c0_20 = arith.constant 0 : index
    %c0_21 = arith.constant 0 : index
    %33 = vector.load %arg4[%c0_19, %c0_20, %c0_21] : memref<1x2x256xf32, #tpu.memory_space<vmem>>, vector<1x2x256xf32>
    tpu.vector_store %arg4[%c0_19, %c0_20, %c0_21], %32 {strides = array<i32>} : memref<1x2x256xf32, #tpu.memory_space<vmem>>, vector<1x2x256xf32>,
    %c0_22 = arith.constant 0 : index
    %c0_23 = arith.constant 0 : index
    %c0_24 = arith.constant 0 : index
    %34 = vector.load %arg5[%c0_22, %c0_23, %c0_24] : memref<1x2x256xf32, #tpu.memory_space<vmem>>, vector<1x2x256xf32>
    %35 = vector.shape_cast %29 : vector<2x256xf32> to vector<1x2x256xf32>
    %36 = arith.addf %34, %35 : vector<1x2x256xf32>
    %c0_25 = arith.constant 0 : index
    %c0_26 = arith.constant 0 : index
    %c0_27 = arith.constant 0 : index
    %37 = vector.load %arg5[%c0_25, %c0_26, %c0_27] : memref<1x2x256xf32, #tpu.memory_space<vmem>>, vector<1x2x256xf32>
    tpu.vector_store %arg5[%c0_25, %c0_26, %c0_27], %36 {strides = array<i32>} : memref<1x2x256xf32, #tpu.memory_space<vmem>>, vector<1x2x256xf32>,
    return
  }
  func.func @transform_0(%arg0: i32, %arg1: i32) -> (i32, i32, i32) {
    %c1_i32 = arith.constant 1 : i32
    %0 = arith.muli %arg0, %c1_i32 : i32
    %1 = arith.addi %0, %arg1 : i32
    %c0_i32 = arith.constant 0 : i32
    %c0_i32_0 = arith.constant 0 : i32
    %c0_i32_1 = arith.constant 0 : i32
    return %c0_i32, %1, %c0_i32_0 : i32, i32, i32
  }
  func.func @transform_1(%arg0: i32, %arg1: i32) -> (i32, i32, i32) {
    %c1_i32 = arith.constant 1 : i32
    %0 = arith.muli %arg0, %c1_i32 : i32
    %1 = arith.addi %0, %arg1 : i32
    %c0_i32 = arith.constant 0 : i32
    %c0_i32_0 = arith.constant 0 : i32
    %c0_i32_1 = arith.constant 0 : i32
    return %c0_i32, %1, %c0_i32_0 : i32, i32, i32
  }
  func.func @transform_2(%arg0: i32, %arg1: i32) -> (i32, i32, i32) {
    %c0_i32 = arith.constant 0 : i32
    %c0_i32_0 = arith.constant 0 : i32
    %c0_i32_1 = arith.constant 0 : i32
    return %arg0, %c0_i32, %c0_i32_0 : i32, i32, i32
  }
  func.func @transform_3(%arg0: i32, %arg1: i32) -> (i32, i32, i32) {
    %c0_i32 = arith.constant 0 : i32
    %c0_i32_0 = arith.constant 0 : i32
    %c0_i32_1 = arith.constant 0 : i32
    return %arg0, %c0_i32, %c0_i32_0 : i32, i32, i32
  }
}

</mosaic_0001>

<bundles_post_ra>
// kernel: tpu_custom_call.1
= control target key start
LH: loop header
LB: loop body
LE: loop exit
PB: predicated region body
PF: predicated region fallthrough
CT: control target
= control target key end

     0   :  { %9 = vsyncpa [#allocation3], 0  ;;  %s452_s0 = inlined_call_operand.hbm [shape: f32[2,1,256], index: 0, kind: input, shape index: {}]   ;;  %s453_s1 = inlined_call_operand.hbm [shape: f32[2,1,256], index: 1, kind: input, shape index: {}]   ;;  %s454_s2 = inlined_call_operand.hbm [shape: f32[1,2,256], index: 2, kind: output, shape index: {0}]   ;;  %s455_s3 = inlined_call_operand.hbm [shape: f32[1,2,256], index: 3, kind: output, shape index: {1}]  }
   0x1   :  { %10 = vsyncpa [#allocation6], 0 }
   0x2   :  { %11 = vsyncpa [#allocation4], 0 }
   0x3   :  { %12 = vsyncpa [#allocation9], 0  ;;  %s20_s14 = sshll.u32 %s452_s0, 4  ;;  %s328_s15 = smov [#allocation2]   ;;  %s21_s14 = int_to_ptr.hbm [resolvable:$true] %s20_s14 }
   0x4   :  { %s22_s16 = sshll.u32 %s328_s15, 4  ;;  %s36_s19 = sshll.u32 %s453_s1, 4  ;;  %s23_s16 = int_to_ptr.vmem [resolvable:$true] %s22_s16  ;;  %s37_s19 = int_to_ptr.hbm [resolvable:$true] %s36_s19 }
   0x5   :  { %s329_s20 = smov 32   ;;  %s330_s21 = smov 2  }
   0x6   :  { %28 = dma.hbm_to_vmem [thread:$0]  %s21_s14, 64, %s23_s16, [#allocation3], %s329_s20, %s329_s20, %s330_s21  }
   0x7   :  { %s331_s22 = smov [#allocation5]  }
   0x8   :  { %s38_s23 = sshll.u32 %s331_s22, 4  ;;  %s39_s23 = int_to_ptr.vmem [resolvable:$true] %s38_s23 }
   0x9   :  { %44 = dma.hbm_to_vmem [thread:$0]  %s37_s19, 64, %s39_s23, [#allocation6], %s329_s20, %s329_s20, %s330_s21  }
   0xa   :  { %320 = dma.done.wait [#allocation3], 64  }
   0xb   :  { %321 = vsyncadd [#allocation3], 4294967232 }
   0xc   :  { %322 = dma.done.wait [#allocation6], 64  }
   0xd   :  { %323 = vsyncadd [#allocation6], 4294967232  ;;  %v332_v0 = vmov 0.0   ;;  %v61_v1 = vld [vmem:[#allocation2] sm:$0x3]  ;;  %s333_s0 = smov [#allocation7]  }
   0xe   :  { %59 = vst [vmem:[#allocation7] sm:$0xf] %v332_v0  ;;  %v363_v2 = vld [vmem:[#allocation5] sm:$0x3]  ;;  %216 = vrcp.f32 %v61_v1  ;;  %v366_v3 = vld [vmem:[#allocation2 + $0x2] sm:$0x3]  ;;  %vm78_vm2 = vweird.f32 %v61_v1 }
   0xf   :  { %60 = vst [vmem:[#allocation8] sm:$0xf] %v332_v0  ;;  %218 = vrcp.f32 %v363_v2  ;;  %v368_v4 = vld [vmem:[#allocation5 + $0x2] sm:$0x3]  ;;  %v82_v5 = vand.u32 2147483647, %v61_v1  ;;  %vm110_vm4 = vweird.f32 %v363_v2  ;;  %vm93_vm9 = vweird.f32 %v366_v3 }
  0x10   :  { %220 = vrcp.f32 %v366_v3  ;;  %v84_v6 = vand.u32 2147483648, %v61_v1  ;;  %v114_v8 = vand.u32 2147483647, %v363_v2  ;;  %v116_v9 = vand.u32 2147483648, %v363_v2  ;;  %s178_s1 = sshll.u32 %s333_s0, 4  ;;  %s180_s26 = sshll.u32 %s454_s2, 4  ;;  %s179_s1 = int_to_ptr.vmem [resolvable:$true] %s178_s1  ;;  %s181_s26 = int_to_ptr.hbm [resolvable:$true] %s180_s26 }
  0x11   :  { %222 = vrcp.f32 %v368_v4  ;;  %vm67_vm0 = vcmp.ne.f32.partialorder %v61_v1, 0.0  ;;  %vm69_vm1 = vcmp.ne.f32.partialorder %v61_v1, -1000.0  ;;  %vm374_vm3 = vcmp.eq.f32.partialorder %v82_v5, 8.507059e+37  ;;  %s334_s27 = smov [#allocation8]   ;;  %s191_s4 = sshll.u32 %s455_s3, 4  ;;  %s192_s4 = int_to_ptr.hbm [resolvable:$true] %s191_s4 }
  0x12   :  { %v85_v15 = vor.u32 1.1754944e-38, %v84_v6  ;;  %vm68_vm6 = vcmp.ne.f32.partialorder %v366_v3, 0.0  ;;  %vm381_vm8 = vcmp.eq.f32.partialorder %v114_v8, 8.507059e+37  ;;  %v117_v19 = vor.u32 1.1754944e-38, %v116_v9  ;;  %vm406_vm15 = vmand %vm67_vm0, %vm69_vm1  ;;  %s189_s28 = sshll.u32 %s334_s27, 4  ;;  %s190_s28 = int_to_ptr.vmem [resolvable:$true] %s189_s28 }
  0x13   :  { %v97_v23 = vand.u32 2147483647, %v366_v3  ;;  %v99_v26 = vand.u32 2147483648, %v366_v3  ;;  %vm125_vm11 = vweird.f32 %v368_v4  ;;  %v131_v31 = vand.u32 2147483648, %v368_v4 }
  0x14   :  { %v217_v7 = vpop.eup %216  ;;  %v129_v34 = vand.u32 2147483647, %v368_v4 }
  0x15   :  { %v219_v10 = vpop.eup %218  ;;  %v74_v11 = vmul.f32 %v217_v7, %v61_v1  ;;  %vm79_vm5 = vweird.f32 %v217_v7  ;;  %v100_v42 = vor.u32 1.1754944e-38, %v99_v26  ;;  %v132_v47 = vor.u32 1.1754944e-38, %v131_v31 }
  0x16   :  { %v106_v13 = vmul.f32 %v219_v10, %v363_v2  ;;  %v221_v16 = vpop.eup %220  ;;  %vm111_vm7 = vweird.f32 %v219_v10  ;;  %vm389_vm10 = vmor %vm78_vm2, %vm79_vm5  ;;  %vm70_vm2 = vcmp.ne.f32.partialorder %v366_v3, -1000.0 }
  0x17   :  { %v75_v14 = vsub.f32 1.0, %v74_v11  ;;  %v223_v20 = vpop.eup %222  ;;  %v89_v22 = vmul.f32 %v221_v16, %v366_v3  ;;  %vm398_vm12 = vmor %vm110_vm4, %vm111_vm7  ;;  %vm94_vm13 = vweird.f32 %v221_v16  ;;  %vm413_vm4 = vcmp.eq.f32.partialorder %v97_v23, 8.507059e+37  ;;  %v153_v3 = vld [vmem:[#allocation7] sm:$0xf] }
  0x18   :  { %v107_v17 = vsub.f32 1.0, %v106_v13  ;;  %v121_v27 = vmul.f32 %v223_v20, %v368_v4  ;;  %vm126_vm14 = vweird.f32 %v223_v20  ;;  %vm423_vm0 = vmor %vm93_vm9, %vm94_vm13  ;;  %vm65_vm7 = vcmp.gt.f32.partialorder %v363_v2, 0.0 }
  0x19   :  { %v76_v21 = vmul.f32 %v217_v7, %v75_v14  ;;  %v90_v30 = vsub.f32 1.0, %v89_v22  ;;  %vm127_vm1 = vmor %vm125_vm11, %vm126_vm14  ;;  %v207_v1 = vsel %vm65_vm7, 1.0, %v332_v0 }
  0x1a   :  { %v108_v25 = vmul.f32 %v219_v10, %v107_v17  ;;  %v122_v33 = vsub.f32 1.0, %v121_v27  ;;  %vm72_vm5 = vmand %vm68_vm6, %vm70_vm2 }
  0x1b   :  { %v77_v28 = vadd.f32 %v217_v7, %v76_v21  ;;  %v91_v37 = vmul.f32 %v221_v16, %v90_v30 }
  0x1c   :  { %v109_v32 = vadd.f32 %v219_v10, %v108_v25  ;;  %v123_v43 = vmul.f32 %v223_v20, %v122_v33 }
  0x1d   :  { %v81_v36 = vsel %vm389_vm10, %v217_v7, %v77_v28  ;;  %v92_v46 = vadd.f32 %v221_v16, %v91_v37 }
  0x1e   :  { %v86_v39 = vsel %vm374_vm3, %v85_v15, %v81_v36  ;;  %v113_v40 = vsel %vm398_vm12, %v219_v10, %v109_v32  ;;  %v124_v49 = vadd.f32 %v223_v20, %v123_v43  ;;  %vm130_vm3 = vcmp.eq.f32.partialorder %v129_v34, 8.507059e+37 }
  0x1f   :  { %v87_v44 = vmul.f32 1000.0, %v86_v39  ;;  %v118_v45 = vsel %vm381_vm8, %v117_v19, %v113_v40  ;;  %v96_v51 = vsel %vm423_vm0, %v221_v16, %v92_v46  ;;  %vm66_vm8 = vcmp.gt.f32.partialorder %v368_v4, 0.0  ;;  %v163_v4 = vld [vmem:[#allocation8] sm:$0xf] }
  0x20   :  { %v119_v48 = vmul.f32 1000.0, %v118_v45  ;;  %v101_v53 = vsel %vm413_vm4, %v100_v42, %v96_v51  ;;  %v128_v54 = vsel %vm127_vm1, %v223_v20, %v124_v49  ;;  %v208_v2 = vsel %vm66_vm8, 1.0, %v332_v0 }
  0x21   :  { %v103_v50 = vsel %vm406_vm15, %v87_v44, 0.0  ;;  %v102_v55 = vmul.f32 1000.0, %v101_v53  ;;  %v133_v56 = vsel %vm130_vm3, %v132_v47, %v128_v54 }
  0x22   :  { %v135_v52 = vsub.f32 %v119_v48, %v103_v50  ;;  %v134_v58 = vmul.f32 1000.0, %v133_v56 }
  0x23   :  { %v104_v59 = vsel %vm72_vm5, %v102_v55, 0.0 }
  0x24   :  { %v137_v57 = vand.u32 2147483647, %v135_v52  ;;  %v136_v61 = vsub.f32 %v134_v58, %v104_v59 }
  0x26   :  { %v139_v60 = vsel %vm65_vm7, %v137_v57, 0.0  ;;  %v138_v62 = vand.u32 2147483647, %v136_v61 }
  0x27   :  { %156 = vst [vmem:[#allocation1] ss:$2 sm:$0xff] %v139_v60 }
  0x28   :  { %v140_v63 = vsel %vm66_vm8, %v138_v62, 0.0 }
  0x29   :  { %158 = vst [vmem:[#allocation1 + $0x1] ss:$2 sm:$0xff] %v140_v63 }
  0x30   :  { %v159_v5 = vld [vmem:[#allocation1] sm:$0xff] }
  0x31   :  { %166 = vst [vmem:[#allocation1] ss:$2 sm:$0xff] %v207_v1  ;;  %v161_v6 = vadd.f32 %v159_v5, %v153_v3 }
  0x32   :  { %168 = vst [vmem:[#allocation1 + $0x1] ss:$2 sm:$0xff] %v208_v2 }
  0x33   :  { %162 = vst [vmem:[#allocation7] sm:$0xf] %v161_v6 }
  0x34   :  { %183 = dma.vmem_to_hbm [thread:$0]  %s179_s1, 64, %s181_s26, [#allocation4]  }
  0x39   :  { %v169_v7 = vld [vmem:[#allocation1] sm:$0xff] }
  0x3a   :  { %v171_v8 = vadd.f32 %v169_v7, %v163_v4 }
  0x3c   :  { %172 = vst [vmem:[#allocation8] sm:$0xf] %v171_v8 }
  0x3d   :  { %194 = dma.vmem_to_hbm [thread:$0]  %s190_s28, 64, %s192_s4, [#allocation9]  }
  0x3e   :  { %324 = dma.done.wait [#allocation4], 64  }
  0x3f   :  { %325 = vsyncadd [#allocation4], 4294967232 }
  0x40   :  { %326 = dma.done.wait [#allocation9], 64  }
  0x41   :  { %327 = vsyncadd [#allocation9], 4294967232 }
  0x42   :  { %203 = vsyncpa [#allocation3], 1 }
  0x43   :  { %204 = vsyncpa [#allocation6], 1 }
  0x44   :  { %205 = vsyncpa [#allocation4], 1 }
  0x45   :  { %206 = vsyncpa [#allocation9], 1 }

</bundles_post_ra>
